<compile_context>
chip_gen: v5e
topology: v5e:2x2
jax: 0.10.0
libtpu: 0.0.40
codegen_flags: <defaults>
</compile_context>

<pallas_src>
import functools

import jax
import jax.numpy as jnp
from jax import lax
from jax.experimental import pallas as pl
from jax.experimental.pallas import tpu as pltpu


def attention_kernel(x_ref, y_ref, wq_ref, wkv_ref, wo_ref, bo_ref,
                     o_ref, kv_ref, oacc_ref, *, heads, dim_head):
    # x_ref   : (1, tq, dim)       bf16
    # y_ref   : (1, Nkv, dim)      bf16   (block index constant across qi ->
    #                                      DMA'd once per batch)
    # wq_ref  : (dim, inner)       bf16   (softmax scale folded in)
    # wkv_ref : (dim, 2*inner)     bf16   fused K|V projection weight
    # wo_ref  : (inner, dim)       bf16
    # bo_ref  : (1, dim)           f32
    # o_ref   : (1, tq, dim)
    # kv_ref  : (Nkv, 2*inner)     bf16   VMEM scratch, persists across qi
    # oacc_ref: (tq, inner)        f32    VMEM scratch, per-head output slab
    inner = heads * dim_head

    # K/V projection: one fused matmul per batch, cached across query tiles.
    @pl.when(pl.program_id(1) == 0)
    def _():
        kv = jnp.dot(y_ref[0], wkv_ref[...],
                     preferred_element_type=jnp.float32)      # (Nkv, 2*inner)
        kv_ref[...] = kv.astype(jnp.bfloat16)

    # Q projection across all heads at once; single f32 -> bf16 cast.
    q = jnp.dot(x_ref[0], wq_ref[...],
                preferred_element_type=jnp.float32).astype(jnp.bfloat16)

    for h in range(heads):                     # static loop, heads is small
        lo = h * dim_head
        qh = q[:, lo:lo + dim_head]                           # (tq, d)  bf16
        kh = kv_ref[:, lo:lo + dim_head]                      # (Nkv, d) bf16
        vh = kv_ref[:, inner + lo:inner + lo + dim_head]      # (Nkv, d) bf16

        # scores: contract last axis of both operands (no explicit transpose)
        dots = lax.dot_general(
            qh, kh,
            dimension_numbers=(((1,), (1,)), ((), ())),
            preferred_element_type=jnp.float32)               # (tq, Nkv) f32

        # numerically stable softmax (f32); normalization deferred to the
        # small (tq, d) head output instead of the (tq, Nkv) matrix.
        m = jnp.max(dots, axis=-1, keepdims=True)
        p = jnp.exp(dots - m)
        denom = jnp.sum(p, axis=-1, keepdims=True)

        oh = jnp.dot(p.astype(jnp.bfloat16), vh,
                     preferred_element_type=jnp.float32)      # (tq, d) unnorm.
        oacc_ref[:, lo:lo + dim_head] = oh * pl.reciprocal(denom, approx=True)

    # 'b h n d -> b n (h d)' has already happened lane-wise in oacc_ref.
    # Fused output projection + bias -> lane-dense (tq, dim) store.
    out = jnp.dot(oacc_ref[...].astype(jnp.bfloat16), wo_ref[...],
                  preferred_element_type=jnp.float32) + bo_ref[...]
    o_ref[0] = out.astype(o_ref.dtype)


def attention_forward(x, y, params, *, heads, dim_head, tq=None):
    """x: (B, N_q, dim), y: (B, N_kv, dim) -> (B, N_q, dim)"""
    B, Nq, dim = x.shape
    _, Nkv, _ = y.shape
    inner_dim = heads * dim_head
    scale = dim_head ** (-0.5)

    # PyTorch Linear weight is (out_features, in_features); y = x @ W.T
    w_q = params["to_q.weight"]            # (inner_dim, dim)
    w_kv = params["to_kv.weight"]          # (2*inner_dim, dim): rows 0:inner=K
    w_o = params["to_out.weight"]          # (dim, inner_dim)
    b_o = params["to_out.bias"]            # (dim,)

    # Pre-transpose to (in, out); fold softmax scale into W_q; keep K|V fused
    # (doubles the MXU output width of the kv projection); bf16 matmul inputs.
    wq_t = (w_q.T * scale).astype(jnp.bfloat16)    # (dim, inner_dim)
    wkv_t = w_kv.T.astype(jnp.bfloat16)            # (dim, 2*inner_dim)
    wo_t = w_o.T.astype(jnp.bfloat16)              # (inner_dim, dim)
    b_o2 = b_o.reshape(1, dim).astype(jnp.float32)

    x_bf = x.astype(jnp.bfloat16)
    y_bf = y.astype(jnp.bfloat16)

    if tq is None:
        tq = Nq
        for cand in (512, 256, 128):               # bigger tiles: fewer grid
            if Nq % cand == 0:                     # steps, better amortization
                tq = cand
                break
    assert Nq % tq == 0, "Nq must be divisible by the query tile size"
    n_qt = Nq // tq

    # Rough VMEM footprint (double-buffered inputs/outputs + scratch + temps),
    # with headroom; clamp to [32 MiB, 64 MiB] so it is valid on v5e/v6e/v7x.
    approx_bytes = (
        2 * tq * dim * 2                 # x tile (bf16, 2 buffers)
        + 2 * Nkv * dim * 2              # y block
        + 2 * dim * inner_dim * 2        # wq
        + 2 * dim * 2 * inner_dim * 2    # wkv
        + 2 * inner_dim * dim * 2        # wo
        + 2 * tq * dim * x.dtype.itemsize  # out tile
        + Nkv * 2 * inner_dim * 2        # kv scratch
        + tq * inner_dim * 4             # oacc scratch
        + tq * inner_dim * 4             # q
        + 4 * tq * Nkv * 4               # softmax temporaries (rough)
    )
    vmem_limit = int(min(64 * 1024 * 1024,
                         max(32 * 1024 * 1024, 2 * approx_bytes)))

    kern = functools.partial(attention_kernel, heads=heads, dim_head=dim_head)

    out = pl.pallas_call(
        kern,
        out_shape=jax.ShapeDtypeStruct((B, Nq, dim), x.dtype),
        grid=(B, n_qt),
        in_specs=[
            pl.BlockSpec((1, tq, dim), lambda b, qi: (b, qi, 0)),       # x tile
            pl.BlockSpec((1, Nkv, dim), lambda b, qi: (b, 0, 0)),       # y (const across qi)
            pl.BlockSpec((dim, inner_dim), lambda b, qi: (0, 0)),       # wq
            pl.BlockSpec((dim, 2 * inner_dim), lambda b, qi: (0, 0)),   # wkv (fused)
            pl.BlockSpec((inner_dim, dim), lambda b, qi: (0, 0)),       # wo
            pl.BlockSpec((1, dim), lambda b, qi: (0, 0)),               # bias
        ],
        out_specs=pl.BlockSpec((1, tq, dim), lambda b, qi: (b, qi, 0)),
        scratch_shapes=[
            pltpu.VMEM((Nkv, 2 * inner_dim), jnp.bfloat16),   # cached K|V
            pltpu.VMEM((tq, inner_dim), jnp.float32),         # per-head out slab
        ],
        compiler_params=pltpu.CompilerParams(
            # batch axis splits across TensorCores (megacore); the query-tile
            # axis must be "arbitrary" so the K/V scratch persists across it.
            dimension_semantics=("parallel", "arbitrary"),
            vmem_limit_bytes=vmem_limit),
    )(x_bf, y_bf, wq_t, wkv_t, wo_t, b_o2)

    return out


def _reference(x, y, params, *, heads, dim_head):
    """Pure-JAX f32 reference mirroring the PyTorch forward."""
    B, Nq, dim = x.shape
    inner_dim = heads * dim_head
    scale = dim_head ** (-0.5)
    w_q = params["to_q.weight"]
    w_kv = params["to_kv.weight"]
    w_o = params["to_out.weight"]
    b_o = params["to_out.bias"]

    kv = y @ w_kv.T                                    # (B, Nkv, 2*inner)
    k, v = kv[..., :inner_dim], kv[..., inner_dim:]
    q = x @ w_q.T

    def split_heads(t):
        b, n, _ = t.shape
        return jnp.transpose(t.reshape(b, n, heads, dim_head), (0, 2, 1, 3))

    q, k, v = map(split_heads, (q, k, v))
    dots = jnp.einsum("bhnd,bhmd->bhnm", q, k) * scale
    attn = jax.nn.softmax(dots, axis=-1)
    out = jnp.einsum("bhnm,bhmd->bhnd", attn, v)
    out = jnp.transpose(out, (0, 2, 1, 3)).reshape(B, Nq, inner_dim)
    return out @ w_o.T + b_o


if __name__ == "__main__":
    # Small, module-consistent shapes (cross-attention: Nkv != Nq).
    B, Nq, Nkv = 2, 8, 16
    dim, heads, dim_head = 32, 4, 16
    inner_dim = heads * dim_head

    key = jax.random.PRNGKey(0)
    kx, ky, kq, kkv, kwo, kbo = jax.random.split(key, 6)

    x = jax.random.normal(kx, (B, Nq, dim), dtype=jnp.float32)
    y = jax.random.normal(ky, (B, Nkv, dim), dtype=jnp.float32)

    params = {
        "to_q.weight": 0.05 * jax.random.normal(kq, (inner_dim, dim), dtype=jnp.float32),
        "to_kv.weight": 0.05 * jax.random.normal(kkv, (2 * inner_dim, dim), dtype=jnp.float32),
        "to_out.weight": 0.05 * jax.random.normal(kwo, (dim, inner_dim), dtype=jnp.float32),
        "to_out.bias": 0.05 * jax.random.normal(kbo, (dim,), dtype=jnp.float32),
    }

    out = attention_forward(x, y, params, heads=heads, dim_head=dim_head)
    out = jax.block_until_ready(out)

    ref = _reference(x, y, params, heads=heads, dim_head=dim_head)
    assert out.shape == (B, Nq, dim)
    # Tolerance loosened for bf16 matmul inputs + approx reciprocal
    # (accumulation and softmax math remain f32).
    assert jnp.allclose(out, ref, atol=3e-2, rtol=3e-2), "mismatch vs reference"

    print("KERNEL_OK")
</pallas_src>

<mosaic_0001>
module attributes {stable_mosaic.version = 11 : i64} {
  func.func @attention_kernel(%arg0: i32, %arg1: i32, %arg2: memref<1x8x32xbf16, #tpu.memory_space<vmem>>, %arg3: memref<1x16x32xbf16, #tpu.memory_space<vmem>>, %arg4: memref<32x64xbf16, #tpu.memory_space<vmem>>, %arg5: memref<32x128xbf16, #tpu.memory_space<vmem>>, %arg6: memref<64x32xbf16, #tpu.memory_space<vmem>>, %arg7: memref<1x32xf32, #tpu.memory_space<vmem>>, %arg8: memref<1x8x32xf32, #tpu.memory_space<vmem>>, %arg9: memref<16x128xbf16, #tpu.memory_space<vmem>>, %arg10: memref<8x64xf32, #tpu.memory_space<vmem>>) attributes {dimension_semantics = [#tpu.dimension_semantics<parallel>, #tpu.dimension_semantics<arbitrary>], iteration_bounds = array<i64: 2, 1>, scalar_prefetch = 0 : i64, scratch_operands = 2 : i64, tpu.core_type = #tpu.core_type<tc>, window_params = [{transform_indices = @transform_0, window_bounds = array<i64: 1, 8, 32>}, {transform_indices = @transform_1, window_bounds = array<i64: 1, 16, 32>}, {pipeline_mode = #tpu.pipeline_mode<synchronous>, transform_indices = @transform_2, window_bounds = array<i64: 32, 64>}, {pipeline_mode = #tpu.pipeline_mode<synchronous>, transform_indices = @transform_3, window_bounds = array<i64: 32, 128>}, {pipeline_mode = #tpu.pipeline_mode<synchronous>, transform_indices = @transform_4, window_bounds = array<i64: 64, 32>}, {pipeline_mode = #tpu.pipeline_mode<synchronous>, transform_indices = @transform_5, window_bounds = array<i64: 1, 32>}, {transform_indices = @transform_6, window_bounds = array<i64: 1, 8, 32>}]} {
    %c0_i32 = arith.constant 0 : i32
    %0 = arith.cmpi eq, %arg1, %c0_i32 : i32
    %1 = arith.extui %0 : i1 to i32
    %c0_i32_0 = arith.constant 0 : i32
    %2 = arith.cmpi ne, %1, %c0_i32_0 : i32
    scf.if %2 {
      %c0_48 = arith.constant 0 : index
      %c0_49 = arith.constant 0 : index
      %c0_50 = arith.constant 0 : index
      %86 = vector.load %arg3[%c0_48, %c0_49, %c0_50] : memref<1x16x32xbf16, #tpu.memory_space<vmem>>, vector<1x16x32xbf16>
      %87 = vector.shape_cast %86 : vector<1x16x32xbf16> to vector<16x32xbf16>
      %c0_51 = arith.constant 0 : index
      %c0_52 = arith.constant 0 : index
      %88 = vector.load %arg5[%c0_51, %c0_52] : memref<32x128xbf16, #tpu.memory_space<vmem>>, vector<32x128xbf16>
      %cst_53 = arith.constant dense<0.000000e+00> : vector<16x128xf32>
      %89 = tpu.matmul %87, %88, %cst_53 {dimension_numbers = #tpu.dot_dimension_numbers<[1], [0], [0], [1], [0, 0, 1, 1], [], []>} : vector<16x32xbf16>, vector<32x128xbf16>, vector<16x128xf32> -> vector<16x128xf32>
      %90 = arith.truncf %89 : vector<16x128xf32> to vector<16x128xbf16>
      %c0_54 = arith.constant 0 : index
      %c0_55 = arith.constant 0 : index
      %91 = vector.load %arg9[%c0_54, %c0_55] : memref<16x128xbf16, #tpu.memory_space<vmem>>, vector<16x128xbf16>
      tpu.vector_store %arg9[%c0_54, %c0_55], %90 {strides = array<i32>} : memref<16x128xbf16, #tpu.memory_space<vmem>>, vector<16x128xbf16>,
    } else {
    }
    %c0 = arith.constant 0 : index
    %c0_1 = arith.constant 0 : index
    %c0_2 = arith.constant 0 : index
    %3 = vector.load %arg2[%c0, %c0_1, %c0_2] : memref<1x8x32xbf16, #tpu.memory_space<vmem>>, vector<1x8x32xbf16>
    %4 = vector.shape_cast %3 : vector<1x8x32xbf16> to vector<8x32xbf16>
    %c0_3 = arith.constant 0 : index
    %c0_4 = arith.constant 0 : index
    %5 = vector.load %arg4[%c0_3, %c0_4] : memref<32x64xbf16, #tpu.memory_space<vmem>>, vector<32x64xbf16>
    %cst = arith.constant dense<0.000000e+00> : vector<8x64xf32>
    %6 = tpu.matmul %4, %5, %cst {dimension_numbers = #tpu.dot_dimension_numbers<[1], [0], [0], [1], [0, 0, 1, 1], [], []>} : vector<8x32xbf16>, vector<32x64xbf16>, vector<8x64xf32> -> vector<8x64xf32>
    %7 = arith.truncf %6 : vector<8x64xf32> to vector<8x64xbf16>
    %8 = vector.extract_strided_slice %7 {offsets = [0, 0], sizes = [8, 16], strides = [1, 1]} : vector<8x64xbf16> to vector<8x16xbf16>
    %c0_5 = arith.constant 0 : index
    %c0_6 = arith.constant 0 : index
    %9 = vector.load %arg9[%c0_5, %c0_6] : memref<16x128xbf16, #tpu.memory_space<vmem>>, vector<16x16xbf16>
    %c0_7 = arith.constant 0 : index
    %c64 = arith.constant 64 : index
    %10 = vector.load %arg9[%c0_7, %c64] : memref<16x128xbf16, #tpu.memory_space<vmem>>, vector<16x16xbf16>
    %cst_8 = arith.constant dense<0.000000e+00> : vector<8x16xf32>
    %11 = tpu.matmul %8, %9, %cst_8 {dimension_numbers = #tpu.dot_dimension_numbers<[1], [1], [0], [0], [0, 0, 1, 0], [], []>} : vector<8x16xbf16>, vector<16x16xbf16>, vector<8x16xf32> -> vector<8x16xf32>
    %cst_9 = arith.constant dense<0xFF800000> : vector<8xf32>
    %12 = vector.multi_reduction <maximumf>, %11, %cst_9 [1] : vector<8x16xf32> to vector<8xf32>
    %13 = vector.shape_cast %12 : vector<8xf32> to vector<8x1xf32>
    %14 = vector.broadcast %13 : vector<8x1xf32> to vector<8x16xf32>
    %15 = arith.subf %11, %14 : vector<8x16xf32>
    %16 = math.exp %15 : vector<8x16xf32>
    %cst_10 = arith.constant dense<0.000000e+00> : vector<8xf32>
    %17 = vector.multi_reduction <add>, %16, %cst_10 [1] : vector<8x16xf32> to vector<8xf32>
    %18 = vector.shape_cast %17 : vector<8xf32> to vector<8x1xf32>
    %19 = arith.truncf %16 : vector<8x16xf32> to vector<8x16xbf16>
    %cst_11 = arith.constant dense<0.000000e+00> : vector<8x16xf32>
    %20 = tpu.matmul %19, %10, %cst_11 {dimension_numbers = #tpu.dot_dimension_numbers<[1], [0], [0], [1], [0, 0, 1, 1], [], []>} : vector<8x16xbf16>, vector<16x16xbf16>, vector<8x16xf32> -> vector<8x16xf32>
    %21 = tpu.reciprocal %18 {approx = true} : vector<8x1xf32> -> vector<8x1xf32>
    %22 = vector.broadcast %21 : vector<8x1xf32> to vector<8x16xf32>
    %23 = arith.mulf %20, %22 : vector<8x16xf32>
    %c0_12 = arith.constant 0 : index
    %c0_13 = arith.constant 0 : index
    %24 = vector.load %arg10[%c0_12, %c0_13] : memref<8x64xf32, #tpu.memory_space<vmem>>, vector<8x16xf32>
    tpu.vector_store %arg10[%c0_12, %c0_13], %23 {strides = array<i32>} : memref<8x64xf32, #tpu.memory_space<vmem>>, vector<8x16xf32>,
    %25 = vector.extract_strided_slice %7 {offsets = [0, 16], sizes = [8, 16], strides = [1, 1]} : vector<8x64xbf16> to vector<8x16xbf16>
    %c0_14 = arith.constant 0 : index
    %c16 = arith.constant 16 : index
    %26 = vector.load %arg9[%c0_14, %c16] : memref<16x128xbf16, #tpu.memory_space<vmem>>, vector<16x16xbf16>
    %c0_15 = arith.constant 0 : index
    %c80 = arith.constant 80 : index
    %27 = vector.load %arg9[%c0_15, %c80] : memref<16x128xbf16, #tpu.memory_space<vmem>>, vector<16x16xbf16>
    %cst_16 = arith.constant dense<0.000000e+00> : vector<8x16xf32>
    %28 = tpu.matmul %25, %26, %cst_16 {dimension_numbers = #tpu.dot_dimension_numbers<[1], [1], [0], [0], [0, 0, 1, 0], [], []>} : vector<8x16xbf16>, vector<16x16xbf16>, vector<8x16xf32> -> vector<8x16xf32>
    %cst_17 = arith.constant dense<0xFF800000> : vector<8xf32>
    %29 = vector.multi_reduction <maximumf>, %28, %cst_17 [1] : vector<8x16xf32> to vector<8xf32>
    %30 = vector.shape_cast %29 : vector<8xf32> to vector<8x1xf32>
    %31 = vector.broadcast %30 : vector<8x1xf32> to vector<8x16xf32>
    %32 = arith.subf %28, %31 : vector<8x16xf32>
    %33 = math.exp %32 : vector<8x16xf32>
    %cst_18 = arith.constant dense<0.000000e+00> : vector<8xf32>
    %34 = vector.multi_reduction <add>, %33, %cst_18 [1] : vector<8x16xf32> to vector<8xf32>
    %35 = vector.shape_cast %34 : vector<8xf32> to vector<8x1xf32>
    %36 = arith.truncf %33 : vector<8x16xf32> to vector<8x16xbf16>
    %cst_19 = arith.constant dense<0.000000e+00> : vector<8x16xf32>
    %37 = tpu.matmul %36, %27, %cst_19 {dimension_numbers = #tpu.dot_dimension_numbers<[1], [0], [0], [1], [0, 0, 1, 1], [], []>} : vector<8x16xbf16>, vector<16x16xbf16>, vector<8x16xf32> -> vector<8x16xf32>
    %38 = tpu.reciprocal %35 {approx = true} : vector<8x1xf32> -> vector<8x1xf32>
    %39 = vector.broadcast %38 : vector<8x1xf32> to vector<8x16xf32>
    %40 = arith.mulf %37, %39 : vector<8x16xf32>
    %c0_20 = arith.constant 0 : index
    %c16_21 = arith.constant 16 : index
    %41 = vector.load %arg10[%c0_20, %c16_21] : memref<8x64xf32, #tpu.memory_space<vmem>>, vector<8x16xf32>
    tpu.vector_store %arg10[%c0_20, %c16_21], %40 {strides = array<i32>} : memref<8x64xf32, #tpu.memory_space<vmem>>, vector<8x16xf32>,
    %42 = vector.extract_strided_slice %7 {offsets = [0, 32], sizes = [8, 16], strides = [1, 1]} : vector<8x64xbf16> to vector<8x16xbf16>
    %c0_22 = arith.constant 0 : index
    %c32 = arith.constant 32 : index
    %43 = vector.load %arg9[%c0_22, %c32] : memref<16x128xbf16, #tpu.memory_space<vmem>>, vector<16x16xbf16>
    %c0_23 = arith.constant 0 : index
    %c96 = arith.constant 96 : index
    %44 = vector.load %arg9[%c0_23, %c96] : memref<16x128xbf16, #tpu.memory_space<vmem>>, vector<16x16xbf16>
    %cst_24 = arith.constant dense<0.000000e+00> : vector<8x16xf32>
    %45 = tpu.matmul %42, %43, %cst_24 {dimension_numbers = #tpu.dot_dimension_numbers<[1], [1], [0], [0], [0, 0, 1, 0], [], []>} : vector<8x16xbf16>, vector<16x16xbf16>, vector<8x16xf32> -> vector<8x16xf32>
    %cst_25 = arith.constant dense<0xFF800000> : vector<8xf32>
    %46 = vector.multi_reduction <maximumf>, %45, %cst_25 [1] : vector<8x16xf32> to vector<8xf32>
    %47 = vector.shape_cast %46 : vector<8xf32> to vector<8x1xf32>
    %48 = vector.broadcast %47 : vector<8x1xf32> to vector<8x16xf32>
    %49 = arith.subf %45, %48 : vector<8x16xf32>
    %50 = math.exp %49 : vector<8x16xf32>
    %cst_26 = arith.constant dense<0.000000e+00> : vector<8xf32>
    %51 = vector.multi_reduction <add>, %50, %cst_26 [1] : vector<8x16xf32> to vector<8xf32>
    %52 = vector.shape_cast %51 : vector<8xf32> to vector<8x1xf32>
    %53 = arith.truncf %50 : vector<8x16xf32> to vector<8x16xbf16>
    %cst_27 = arith.constant dense<0.000000e+00> : vector<8x16xf32>
    %54 = tpu.matmul %53, %44, %cst_27 {dimension_numbers = #tpu.dot_dimension_numbers<[1], [0], [0], [1], [0, 0, 1, 1], [], []>} : vector<8x16xbf16>, vector<16x16xbf16>, vector<8x16xf32> -> vector<8x16xf32>
    %55 = tpu.reciprocal %52 {approx = true} : vector<8x1xf32> -> vector<8x1xf32>
    %56 = vector.broadcast %55 : vector<8x1xf32> to vector<8x16xf32>
    %57 = arith.mulf %54, %56 : vector<8x16xf32>
    %c0_28 = arith.constant 0 : index
    %c32_29 = arith.constant 32 : index
    %58 = vector.load %arg10[%c0_28, %c32_29] : memref<8x64xf32, #tpu.memory_space<vmem>>, vector<8x16xf32>
    tpu.vector_store %arg10[%c0_28, %c32_29], %57 {strides = array<i32>} : memref<8x64xf32, #tpu.memory_space<vmem>>, vector<8x16xf32>,
    %59 = vector.extract_strided_slice %7 {offsets = [0, 48], sizes = [8, 16], strides = [1, 1]} : vector<8x64xbf16> to vector<8x16xbf16>
    %c0_30 = arith.constant 0 : index
    %c48 = arith.constant 48 : index
    %60 = vector.load %arg9[%c0_30, %c48] : memref<16x128xbf16, #tpu.memory_space<vmem>>, vector<16x16xbf16>
    %c0_31 = arith.constant 0 : index
    %c112 = arith.constant 112 : index
    %61 = vector.load %arg9[%c0_31, %c112] : memref<16x128xbf16, #tpu.memory_space<vmem>>, vector<16x16xbf16>
    %cst_32 = arith.constant dense<0.000000e+00> : vector<8x16xf32>
    %62 = tpu.matmul %59, %60, %cst_32 {dimension_numbers = #tpu.dot_dimension_numbers<[1], [1], [0], [0], [0, 0, 1, 0], [], []>} : vector<8x16xbf16>, vector<16x16xbf16>, vector<8x16xf32> -> vector<8x16xf32>
    %cst_33 = arith.constant dense<0xFF800000> : vector<8xf32>
    %63 = vector.multi_reduction <maximumf>, %62, %cst_33 [1] : vector<8x16xf32> to vector<8xf32>
    %64 = vector.shape_cast %63 : vector<8xf32> to vector<8x1xf32>
    %65 = vector.broadcast %64 : vector<8x1xf32> to vector<8x16xf32>
    %66 = arith.subf %62, %65 : vector<8x16xf32>
    %67 = math.exp %66 : vector<8x16xf32>
    %cst_34 = arith.constant dense<0.000000e+00> : vector<8xf32>
    %68 = vector.multi_reduction <add>, %67, %cst_34 [1] : vector<8x16xf32> to vector<8xf32>
    %69 = vector.shape_cast %68 : vector<8xf32> to vector<8x1xf32>
    %70 = arith.truncf %67 : vector<8x16xf32> to vector<8x16xbf16>
    %cst_35 = arith.constant dense<0.000000e+00> : vector<8x16xf32>
    %71 = tpu.matmul %70, %61, %cst_35 {dimension_numbers = #tpu.dot_dimension_numbers<[1], [0], [0], [1], [0, 0, 1, 1], [], []>} : vector<8x16xbf16>, vector<16x16xbf16>, vector<8x16xf32> -> vector<8x16xf32>
    %72 = tpu.reciprocal %69 {approx = true} : vector<8x1xf32> -> vector<8x1xf32>
    %73 = vector.broadcast %72 : vector<8x1xf32> to vector<8x16xf32>
    %74 = arith.mulf %71, %73 : vector<8x16xf32>
    %c0_36 = arith.constant 0 : index
    %c48_37 = arith.constant 48 : index
    %75 = vector.load %arg10[%c0_36, %c48_37] : memref<8x64xf32, #tpu.memory_space<vmem>>, vector<8x16xf32>
    tpu.vector_store %arg10[%c0_36, %c48_37], %74 {strides = array<i32>} : memref<8x64xf32, #tpu.memory_space<vmem>>, vector<8x16xf32>,
    %c0_38 = arith.constant 0 : index
    %c0_39 = arith.constant 0 : index
    %76 = vector.load %arg10[%c0_38, %c0_39] : memref<8x64xf32, #tpu.memory_space<vmem>>, vector<8x64xf32>
    %77 = arith.truncf %76 : vector<8x64xf32> to vector<8x64xbf16>
    %c0_40 = arith.constant 0 : index
    %c0_41 = arith.constant 0 : index
    %78 = vector.load %arg6[%c0_40, %c0_41] : memref<64x32xbf16, #tpu.memory_space<vmem>>, vector<64x32xbf16>
    %cst_42 = arith.constant dense<0.000000e+00> : vector<8x32xf32>
    %79 = tpu.matmul %77, %78, %cst_42 {dimension_numbers = #tpu.dot_dimension_numbers<[1], [0], [0], [1], [0, 0, 1, 1], [], []>} : vector<8x64xbf16>, vector<64x32xbf16>, vector<8x32xf32> -> vector<8x32xf32>
    %c0_43 = arith.constant 0 : index
    %c0_44 = arith.constant 0 : index
    %80 = vector.load %arg7[%c0_43, %c0_44] : memref<1x32xf32, #tpu.memory_space<vmem>>, vector<1x32xf32>
    %81 = vector.broadcast %80 : vector<1x32xf32> to vector<8x32xf32>
    %82 = arith.addf %79, %81 : vector<8x32xf32>
    %c0_45 = arith.constant 0 : index
    %c0_46 = arith.constant 0 : index
    %c0_47 = arith.constant 0 : index
    %83 = vector.load %arg8[%c0_45, %c0_46, %c0_47] : memref<1x8x32xf32, #tpu.memory_space<vmem>>, vector<1x8x32xf32>
    %84 = vector.shape_cast %83 : vector<1x8x32xf32> to vector<8x32xf32>
    %85 = vector.shape_cast %82 : vector<8x32xf32> to vector<1x8x32xf32>
    tpu.vector_store %arg8[%c0_45, %c0_46, %c0_47], %85 {strides = array<i32>} : memref<1x8x32xf32, #tpu.memory_space<vmem>>, vector<1x8x32xf32>,
    return
  }
  func.func @transform_0(%arg0: i32, %arg1: i32) -> (i32, i32, i32) {
    %c0_i32 = arith.constant 0 : i32
    %c0_i32_0 = arith.constant 0 : i32
    return %arg0, %arg1, %c0_i32 : i32, i32, i32
  }
  func.func @transform_1(%arg0: i32, %arg1: i32) -> (i32, i32, i32) {
    %c0_i32 = arith.constant 0 : i32
    %c0_i32_0 = arith.constant 0 : i32
    %c0_i32_1 = arith.constant 0 : i32
    return %arg0, %c0_i32, %c0_i32_0 : i32, i32, i32
  }
  func.func @transform_2(%arg0: i32, %arg1: i32) -> (i32, i32) {
    %c0_i32 = arith.constant 0 : i32
    %c0_i32_0 = arith.constant 0 : i32
    %c0_i32_1 = arith.constant 0 : i32
    return %c0_i32, %c0_i32_0 : i32, i32
  }
  func.func @transform_3(%arg0: i32, %arg1: i32) -> (i32, i32) {
    %c0_i32 = arith.constant 0 : i32
    %c0_i32_0 = arith.constant 0 : i32
    %c0_i32_1 = arith.constant 0 : i32
    return %c0_i32, %c0_i32_0 : i32, i32
  }
  func.func @transform_4(%arg0: i32, %arg1: i32) -> (i32, i32) {
    %c0_i32 = arith.constant 0 : i32
    %c0_i32_0 = arith.constant 0 : i32
    %c0_i32_1 = arith.constant 0 : i32
    return %c0_i32, %c0_i32_0 : i32, i32
  }
  func.func @transform_5(%arg0: i32, %arg1: i32) -> (i32, i32) {
    %c0_i32 = arith.constant 0 : i32
    %c0_i32_0 = arith.constant 0 : i32
    %c0_i32_1 = arith.constant 0 : i32
    return %c0_i32, %c0_i32_0 : i32, i32
  }
  func.func @transform_6(%arg0: i32, %arg1: i32) -> (i32, i32, i32) {
    %c0_i32 = arith.constant 0 : i32
    %c0_i32_0 = arith.constant 0 : i32
    return %arg0, %arg1, %c0_i32 : i32, i32, i32
  }
}

</mosaic_0001>

<bundles_post_ra>
// kernel: tpu_custom_call.1
= control target key start
LH: loop header
LB: loop body
LE: loop exit
PB: predicated region body
PF: predicated region fallthrough
CT: control target
= control target key end

     0   :  { %11 = vsyncpa [#allocation5], 0  ;;  %s1345_s0 = inlined_call_operand.hbm [shape: bf16[2,8,32], index: 0, kind: input, shape index: {}]   ;;  %s1346_s1 = inlined_call_operand.vmem [shape: bf16[2,16,32], index: 1, kind: input, shape index: {}]   ;;  %s1347_s2 = inlined_call_operand.vmem [shape: bf16[32,64], index: 2, kind: input, shape index: {}]   ;;  %s1348_s3 = inlined_call_operand.vmem [shape: bf16[32,128], index: 3, kind: input, shape index: {}]   ;;  %s1349_s4 = inlined_call_operand.vmem [shape: bf16[64,32], index: 4, kind: input, shape index: {}]   ;;  %s1350_s5 = inlined_call_operand.vmem [shape: f32[1,32], index: 5, kind: input, shape index: {}]   ;;  %s1351_s6 = inlined_call_operand.hbm [shape: f32[2,8,32], index: 6, kind: output, shape index: {}]  }
   0x1   :  { %13 = vsyncpa [#allocation5 + $0x1], 0 }
   0x2   :  { %14 = vsyncpa [#allocation6], 0 }
   0x3   :  { %16 = vsyncpa [#allocation6 + $0x1], 0  ;;  %s1158_s21 = smov 0   ;;  %s1160_s22 = smov 0  }
   0x4   :  { %s1162_s23 = smov 0   ;;  %s1164_s24 = smov 0  }
   0x5   :  { %s1166_s25 = smov 0   ;;  %s1168_s26 = smov 0  }
   0x6 LB: > { %s819_s27 = sadd.s32 4294967295, %s1114_s26   ;;  %s820_s28 = sadd.s32 4294967294, %s1114_s26   ;;  %s1114_s26 = sphi %s1168_s26, %s22_s26   ;;  %s1110_s25 = sphi %s1166_s25, %s1360_s25   ;;  %s1106_s24 = sphi %s1164_s24, %s1359_s24   ;;  %s1102_s23 = sphi %s1162_s23, %s1358_s23   ;;  %s1098_s22 = sphi %s1160_s22, %s1357_s22   ;;  %s1094_s21 = sphi %s1158_s21, %s1356_s21  }
   0x7   : > { %s34_s29 = sadd.s32 1, %s1110_s25  ;;  %s43_s30 = sadd.s32 1, %s1102_s23 }
   0x8   : > { %p36_p0 = scmp.ge.s32.totalorder %s34_s29, 2  ;;  %p50_p1 = scmp.ne.s32.totalorder %s1102_s23, %s1098_s22 }
   0x9   : > { %p51_p2 = scmp.eq.s32.totalorder %s1114_s26, 0  ;;  %p56_p3 = scmp.ne.s32.totalorder %s1098_s22, %s1094_s21 }
   0xa   : > { %s1362_s29 = smov (%p36_p0, %s34_s29), 0  ;;  %p57_p5 = scmp.eq.s32.totalorder %s819_s27, 0 }
   0xb   : > { %p1199_p4 = por %p51_p2, %p50_p1  ;;  %s38_s8 = ssub.s32 %s1110_s25, %s1362_s29 }
   0xc   : > { %p192_p6 = scmp.eq.s32.totalorder %s819_s27, 1  ;;  %p41_p7 = scmp.eq.s32.totalorder %s38_s8, 0 }
   0xd   : > { %p1205_p8 = por %p57_p5, %p56_p3  ;;  %p198_p10 = scmp.eq.s32.totalorder %s820_s28, 1 }
   0xe   : > { %p1209_p9 = por %p192_p6, %p50_p1  ;;  %p822_p12 = scmp.ge.s32.totalorder %s1114_s26, 2 }
   0xf   : > { %s1214_s11 = scalar_select %p41_p7, %s1102_s23, %s43_s30  }
  0x10   : > { %p1216_p11 = por %p198_p10, %p56_p3  ;;  %p928_p13 = scmp.lt.s32.totalorder %s1114_s26, 2 }
  0x11   : > { %s230_s13 = sand.u32 1, %s1102_s23   ;;  %s824_s15 = sshll.u32 %s1110_s25, 2 }
  0x12   : > { %s823_s14 = sshll.u32 %s230_s13, 2  ;;  %s239_s18 = scalar_lea.hbm %s1345_s0, %s824_s15 }
  0x13   : > { %s234_s19 = scalar_lea.vmem [#allocation4], %s823_s14  ;;  %s241_s27 = sshll.u32 %s239_s18, 4  ;;  %s242_s27 = int_to_ptr.hbm [resolvable:$true] %s241_s27 }
  0x14   : > { %s243_s20 = sshll.u32 %s234_s19, 4  ;;  %p921_p0 = pnand %p928_p13, %p1199_p4  ;;  %s244_s20 = int_to_ptr.vmem [resolvable:$true] %s243_s20 }
  0x15   : > { %p825_p1 = scmp.ge.s32.totalorder %s1114_s26, 1  ;;  %p256_p2 = scmp.lt.s32.totalorder %s1114_s26, 3 }
  0x16   : > { %s231_s28 = scalar_lea.sflag [#allocation5], %s230_s13 }
  0x17   : > { %923 = dma.hbm_to_vmem [thread:$0]  (!%p921_p0), %s242_s27, 64, %s244_s20, %s231_s28  }
  0x18   : > { %p257_p3 = pnand %p825_p1, %p256_p2 }
  0x19   : > { %s1232_s30 = sand.u32 (!%p257_p3), 1, %s1098_s22  }
  0x1a   : > { %260 = sbr.rel (%p257_p3) target bundleno = 1146 (0x47a), region = 44  ;;  %s826_s8 = sshll.u32 (!%p257_p3), %s1232_s30, 2 }
  0x1b   : > { %s263_s14 = scalar_lea.sflag (!%p257_p3), [#allocation5], %s1232_s30  ;;  %s266_s15 = scalar_lea.vmem (!%p257_p3), [#allocation4], %s826_s8 }
  0x1f   : > { %1085 = dma.done.wait (%p1205_p8), %s263_s14, 64  }
  0x20   : > { %1087 = vsyncadd (%p1205_p8), %s263_s14, 4294967232  ;;  %p301_p4 = scmp.lt.s32.totalorder %s1106_s24, 1  ;;  %v900_v0 = vld [vmem:[%s1348_s3 + $0x8] sm:$0xff]  ;;  %v899_v2 = vld [vmem:[%s1348_s3] sm:$0xff]  ;;  %vm334_vm0 = vcmask 261120   ;;  %vm398_vm1 = vcmask 130048  }
  0x21   : > { %v902_v1 = vld [vmem:[%s1347_s2 + $0x8] sm:$0xff]  ;;  %344 = vmatpush.bf16.msra.mxu0 %v900_v0  ;;  %v901_v3 = vld [vmem:[%s1347_s2] sm:$0xff]  ;;  %v356_v5 = vld [vmem:[%s266_s15] sm:$0xf]  ;;  %s1117_s16 = smov 112   ;;  %s1118_s15 = smov 80  }
  0x22   : > { %s302_s7 = scalar_select %p301_p4, %s1106_s24, 1  ;;  %383 = vmatpush.bf16.msra.mxu1 %v902_v1  ;;  %vm518_vm2 = vcmask 261248   ;;  %vm585_vm3 = vcmask 392448   ;;  %vm652_vm4 = vcmask 523648   ;;  %vm692_vm5 = vcmask 523264  }
  0x23   : > { %s1119_s17 = smov 64   ;;  %s1120_s18 = smov 48  }
  0x24   : > { %s897_s13 = sshll.u32 %s302_s7, 3  ;;  %s1121_s19 = smov 32  }
  0x25   : > { %s305_s8 = scalar_lea.vmem %s1346_s1, %s897_s13  ;;  %345 = vmatpush.bf16.msra.mxu0 %v899_v2  ;;  %s1116_s13 = smov 96  }
  0x26   : > { %v898_v4 = vld [vmem:[%s305_s8] sm:$0xff]  ;;  %384 = vmatpush.bf16.msra.mxu1 %v901_v3  ;;  %s1122_s20 = smov 16  }
  0x28   : > { %842 = vmatmul.msk.bf16.vlgmr.msra.gmra.mxu0 %vm334_vm0, %v898_v4 }
  0x29   : > { %851 = vmatmul.msk.bf16.vlgmr.msra.gmra.mxu1 %vm334_vm0, %v356_v5 }
  0xa5   : > { %v347_v6 = vpop.f32.mrf.mxu0 }
  0xa6   : > { %v386_v7 = vpop.f32.mrf.mxu1 }
  0xa7   : > { %v390_v11 = vpack.c.bf16 %v386_v7, %v386_v7 }
  0xa9   : > { %v453_v15 = vunpack.c.l.b16 %v390_v11 }
  0xab   : > { %v454_v17 = vpack.c.b16 %v453_v15, %v453_v15 }
  0xad   : > { %v349_v8 = vpop.f32.mrf.mxu0 }
  0xae   : > { %v914_v9 = vpack.c.bf16 %v349_v8, %v347_v6  ;;  %v388_v10 = vpop.f32.mrf.mxu1 }
  0xb0   : > { %915 = vst [vmem:[#allocation2] sm:$0xff] %v914_v9  }
  0xb7   : > { %v905_v12 = vld [vmem:[#allocation2] sm:$0xff] }
  0xb8   : > { %v904_v13 = vld [vmem:[#allocation2] sm:$0xff]  ;;  %529 = vrot.lane.b32.xlu2 %v905_v12, %s1116_s13 }
  0xb9   : > { %v903_v14 = vld [vmem:[#allocation2] sm:$0xff]  ;;  %462 = vrot.lane.b32.xlu1 %v904_v13, %s1117_s16 }
  0xba   : > { %v403_v16 = vsel %vm398_vm1, %v903_v14, 0  ;;  %v1260_v18 = vld [vmem:[#allocation2] sm:$0xff] }
  0xbb   : > { %412 = vmatpush.bf16.xpose.msra.mxu2 %v403_v16 }
  0xc0   : > { %596 = vrot.lane.b32.xlu2 %v1260_v18, %s1118_s15 }
  0xc1   : > { %455 = vrot.lane.b32.xlu1 %v454_v17, %s1117_s16 }
  0xc2   : > { %856 = vmatmul.msk.bf16.vlgmr.msra.gmra.mxu2 %vm398_vm1, %v390_v11 }
  0xc8   : > { %589 = vrot.lane.b32.xlu2 %v454_v17, %s1118_s15  ;;  %s894_s15 = sshll.u32 %s1106_s24, 3  ;;  %s711_s24 = scalar_lea.sflag [#allocation6], %s1232_s30 }
  0xc9   : > { %522 = vrot.lane.b32.xlu1 %v454_v17, %s1116_s13 }
 0x112   : > { %v530_v19 = vpop.permute.xlu2 %529 }
 0x113   : > { %v535_v20 = vsel %vm398_vm1, %v530_v19, 0 }
 0x114   : > { %544 = vmatpush.bf16.xpose.msrb.mxu1 %v535_v20 }
 0x11a   : > { %v597_v35 = vpop.permute.xlu2 %596 }
 0x11b   : > { %v602_v38 = vsel %vm398_vm1, %v597_v35, 0 }
 0x122   : > { %v590_v40 = vpop.permute.xlu2 %589 }
 0x12b   : > { %v463_v21 = vpop.permute.xlu1 %462 }
 0x12c   : > { %v468_v36 = vsel %vm398_vm1, %v463_v21, 0 }
 0x133   : > { %v456_v22 = vpop.permute.xlu1 %455 }
 0x13b   : > { %v523_v23 = vpop.permute.xlu1 %522 }
 0x13c   : > { %868 = vmatmul.msk.bf16.vlgmr.msrb.gmra.mxu1 %vm398_vm1, %v523_v23 }
 0x145   : > { %v414_v24 = vpop.f32.mrf.mxu2 }
 0x146   : > { %v418_v25 = vsel %vm398_vm1, %v414_v24, -inf }
 0x147   : > { %419 = vmax.xlane.f32.xlu0 %v418_v25  ;;  %v909_v25 = vld [vmem:[%s1349_s4 + $0x10] sm:$0xff] }
 0x14d   : > { %v416_v26 = vpop.f32.mrf.mxu2 }
 0x14e   : > { %v908_v26 = vld [vmem:[%s1349_s4 + $0x8] sm:$0xff] }
 0x15b   : > { %428 = vrot.lane.b32.xlu0 %v903_v14, %s1119_s17  ;;  %s827_s17 = sshll.u32 %s1232_s30, 3 }
 0x15c   : > { %s300_s28 = scalar_lea.vmem [#allocation7], %s827_s17  ;;  %s1052_s17 = scalar_lea.hbm %s1351_s6, 16 }
 0x15d   : > { %s724_s8 = sshll.u32 %s300_s28, 4  ;;  %s725_s8 = int_to_ptr.vmem [resolvable:$true] %s724_s8 }
 0x163   : > { %493 = vrot.lane.b32.xlu0 %v904_v13, %s1120_s18 }
 0x1b9   : > { %v546_v27 = vpop.f32.mrf.mxu1 }
 0x1ba   : > { %v550_v28 = vsel %vm398_vm1, %v546_v27, -inf  ;;  %v420_v29 = vpop.xlane.xlu0 %419 }
 0x1bb   : > { %551 = vmax.xlane.f32.xlu2 %v550_v28  ;;  %v421_v30 = vsub.f32 %v414_v24, %v420_v29  ;;  %v910_v24 = vld [vmem:[%s1349_s4 + $0x18] sm:$0xff] }
 0x1bc   : > { %700 = vmatpush.bf16.msra.mxu1 %v910_v24 }
 0x1bd   : > { %v422_v32 = vmul.f32 1.442695, %v421_v30 }
 0x1bf   : > { %986 = vpow2.f32 %v422_v32 }
 0x1c0   : > { %701 = vmatpush.bf16.msra.mxu1 %v909_v25 }
 0x1c1   : > { %v548_v31 = vpop.f32.mrf.mxu1 }
 0x1c4   : > { %702 = vmatpush.bf16.msra.mxu1 %v908_v26 }
 0x1c5   : > { %v987_v33 = vpop.eup %986 }
 0x1c6   : > { %v427_v37 = vpack.c.bf16 %v987_v33, %v987_v33  ;;  %v424_v56 = vsel %vm398_vm1, %v987_v33, 0.0  ;;  %v985_v33 = vld [vmem:[%s1350_s5] ss:$0 sm:$0xff] }
 0x1cd   : > { %v429_v34 = vpop.permute.xlu0 %428 }
 0x1ce   : > { %441 = vmatpush.bf16.msra.mxu3 %v429_v34 }
 0x1d1   : > { %857 = vmatmul.msk.bf16.vlgmr.msra.gmra.mxu3 %vm398_vm1, %v427_v37 }
 0x1d2   : > { %477 = vmatpush.bf16.xpose.msrb.mxu3 %v468_v36 }
 0x1d3   : > { %560 = vrot.lane.b32.xlu2 %v905_v12, %s1121_s19 }
 0x1d5   : > { %v494_v39 = vpop.permute.xlu0 %493 }
 0x1d6   : > { %506 = vmatpush.bf16.msrb.mxu0 %v494_v39 }
 0x1da   : > { %611 = vmatpush.bf16.xpose.msra.mxu3 %v602_v38 }
 0x1e1   : > { %862 = vmatmul.msk.bf16.vlgmr.msrb.gmra.mxu3 %vm398_vm1, %v456_v22 }
 0x1f1   : > { %874 = vmatmul.msk.bf16.vlgmr.msra.gmra.mxu3 %vm398_vm1, %v590_v40 }
 0x22e   : > { %v552_v41 = vpop.xlane.xlu2 %551 }
 0x22f   : > { %v553_v42 = vsub.f32 %v546_v27, %v552_v41  ;;  %v907_v27 = vld [vmem:[%s1349_s4] sm:$0xff] }
 0x230   : > { %703 = vmatpush.bf16.msra.mxu1 %v907_v27 }
 0x231   : > { %v554_v43 = vmul.f32 1.442695, %v553_v42 }
 0x233   : > { %988 = vpow2.f32 %v554_v43 }
 0x236   : > { %v561_v44 = vpop.permute.xlu2 %560 }
 0x237   : > { %573 = vmatpush.bf16.msrb.mxu2 %v561_v44 }
 0x239   : > { %v989_v45 = vpop.eup %988 }
 0x23a   : > { %v559_v46 = vpack.c.bf16 %v989_v45, %v989_v45  ;;  %v556_v55 = vsel %vm398_vm1, %v989_v45, 0.0 }
 0x23c   : > { %869 = vmatmul.msk.bf16.vlgmr.msrb.gmra.mxu2 %vm398_vm1, %v559_v46 }
 0x254   : > { %v443_v47 = vpop.f32.mrf.mxu3 }
 0x25c   : > { %v445_v48 = vpop.f32.mrf.mxu3 }
 0x264   : > { %v479_v49 = vpop.f32.mrf.mxu3 }
 0x265   : > { %v483_v50 = vsel %vm398_vm1, %v479_v49, -inf }
 0x266   : > { %484 = vmax.xlane.f32.xlu1 %v483_v50 }
 0x26c   : > { %v481_v51 = vpop.f32.mrf.mxu3 }
 0x274   : > { %v613_v52 = vpop.f32.mrf.mxu3 }
 0x275   : > { %v617_v53 = vsel %vm398_vm1, %v613_v52, -inf }
 0x276   : > { %618 = vmax.xlane.f32.xlu0 %v617_v53 }
 0x27c   : > { %v615_v54 = vpop.f32.mrf.mxu3 }
 0x27e   : > { %557 = vadd.xlane.f32.xlu0 %v556_v55 }
 0x27f   : > { %627 = vrot.lane.b32.xlu1 %v1260_v18, %s1122_s20 }
 0x2a9   : > { %425 = vadd.xlane.f32.xlu1 %v424_v56 }
 0x2bf   : > { %v575_v57 = vpop.f32.mrf.mxu2 }
 0x2c7   : > { %v577_v58 = vpop.f32.mrf.mxu2 }
 0x2d9   : > { %v485_v59 = vpop.xlane.xlu1 %484 }
 0x2da   : > { %v486_v60 = vsub.f32 %v479_v49, %v485_v59 }
 0x2dc   : > { %v487_v61 = vmul.f32 1.442695, %v486_v60 }
 0x2de   : > { %990 = vpow2.f32 %v487_v61 }
 0x2e4   : > { %v991_v62 = vpop.eup %990 }
 0x2e5   : > { %v489_v63 = vsel %vm398_vm1, %v991_v62, 0.0  ;;  %v492_v0 = vpack.c.bf16 %v991_v62, %v991_v62 }
 0x2e6   : > { %490 = vadd.xlane.f32.xlu0 %v489_v63 }
 0x2e7   : > { %863 = vmatmul.msk.bf16.vlgmr.msrb.gmra.mxu0 %vm398_vm1, %v492_v0 }
 0x2e9   : > { %v619_v1 = vpop.xlane.xlu0 %618 }
 0x2ea   : > { %v620_v2 = vsub.f32 %v613_v52, %v619_v1 }
 0x2ec   : > { %v621_v3 = vmul.f32 1.442695, %v620_v2 }
 0x2ee   : > { %992 = vpow2.f32 %v621_v3 }
 0x2f1   : > { %v628_v4 = vpop.permute.xlu1 %627  ;;  %v558_v5 = vpop.xlane.xlu0 %557 }
 0x2f2   : > { %994 = vrcp.f32 %v558_v5  ;;  %640 = vmatpush.bf16.msra.mxu0 %v628_v4 }
 0x2f4   : > { %v993_v6 = vpop.eup %992 }
 0x2f5   : > { %v626_v7 = vpack.c.bf16 %v993_v6, %v993_v6  ;;  %v623_v8 = vsel %vm398_vm1, %v993_v6, 0.0 }
 0x2f6   : > { %624 = vadd.xlane.f32.xlu2 %v623_v8 }
 0x2f7   : > { %875 = vmatmul.msk.bf16.vlgmr.msra.gmra.mxu0 %vm398_vm1, %v626_v7 }
 0x2f8   : > { %v995_v9 = vpop.eup %994 }
 0x2f9   : > { %v580_v10 = vmul.f32 %v995_v9, %v575_v57 }
 0x2fb   : > { %582 = vrot.lane.b32.xlu0 %v580_v10, %s1121_s19 }
 0x31c   : > { %v426_v11 = vpop.xlane.xlu1 %425 }
 0x31d   : > { %996 = vrcp.f32 %v426_v11 }
 0x323   : > { %v997_v12 = vpop.eup %996 }
 0x324   : > { %v448_v13 = vmul.f32 %v997_v12, %v443_v47 }
 0x326   : > { %449 = vst.msk [vmem:[#allocation3] sm:$0xff] %vm398_vm1, %v448_v13 }
 0x359   : > { %v491_v14 = vpop.xlane.xlu0 %490 }
 0x35a   : > { %998 = vrcp.f32 %v491_v14 }
 0x360   : > { %v999_v15 = vpop.eup %998 }
 0x364   : > { %v508_v16 = vpop.f32.mrf.mxu0 }
 0x365   : > { %v513_v17 = vmul.f32 %v999_v15, %v508_v16 }
 0x367   : > { %515 = vrot.lane.b32.xlu0 %v513_v17, %s1122_s20  ;;  %s722_s20 = scalar_lea.hbm %s1351_s6, %s894_s15 }
 0x368   : > { %s726_s14 = sshll.u32 %s722_s20, 4  ;;  %s727_s14 = int_to_ptr.hbm [resolvable:$true] %s726_s14 }
 0x369   : > { %v625_v18 = vpop.xlane.xlu2 %624  ;;  %s1046_s7 = sshra.s32 %s727_s14, 4  ;;  %s1047_s7 = int_to_ptr.hbm [resolvable:$true] %s1046_s7 }
 0x36a   : > { %1000 = vrcp.f32 %v625_v18  ;;  %s1048_s13 = scalar_lea.hbm %s1047_s7, 8  ;;  %p1053_p8 = scmp.lt.s32.totalorder %s1047_s7, %s1351_s6 }
 0x36b   : > { %p1049_p5 = scmp.ne.s32.totalorder %s1047_s7, %s1048_s13  ;;  %p1054_p10 = scmp.lt.s32.totalorder %s1052_s17, %s1048_s13 }
 0x36c   : > { %v510_v19 = vpop.f32.mrf.mxu0 }
 0x36d   : > { %v583_v28 = vpop.permute.xlu0 %582  ;;  %p1050_p6 = pnand %p1049_p5, %p1209_p9  ;;  %p1055_p13 = por %p1054_p10, %p1053_p8 }
 0x36f   : > { %p1051_p7 = pneg %p1050_p6 }
 0x370   : > { %v1001_v20 = vpop.eup %1000 }
 0x371   : > { %p1056_p0 = pnand %p1055_p13, %p1051_p7 }
 0x374   : > { %v642_v21 = vpop.f32.mrf.mxu0 }
 0x375   : > { %v647_v22 = vmul.f32 %v1001_v20, %v642_v21 }
 0x377   : > { %649 = vrot.lane.b32.xlu0 %v647_v22, %s1120_s18 }
 0x37c   : > { %v644_v23 = vpop.f32.mrf.mxu0 }
 0x3d9   : > { %v516_v29 = vpop.permute.xlu0 %515 }
 0x3da   : > { %519 = vst.msk [vmem:[#allocation3] sm:$0xff] %vm518_vm2, %v516_v29 }
 0x3db   : > { %586 = vst.msk [vmem:[#allocation3] sm:$0xff] %vm585_vm3, %v583_v28 }
 0x3e9   : > { %v650_v30 = vpop.permute.xlu0 %649 }
 0x3ea   : > { %653 = vst.msk [vmem:[#allocation3] sm:$0xff] %vm652_vm4, %v650_v30 }
 0x3f1   : > { %v654_v31 = vld [vmem:[#allocation3] sm:$0xff] }
 0x3f2   : > { %v655_v32 = vpack.c.bf16 %v654_v31, %v654_v31 }
 0x3f4   : > { %892 = vmatmul.msk.bf16.vlgmr.msra.gmra.mxu1 %vm692_vm5, %v655_v32 }
 0x471   : > { %v705_v34 = vpop.f32.mrf.mxu1 }
 0x472   : > { %v706_v35 = vadd.f32 %v985_v33, %v705_v34 }
 0x474   : > { %709 = vst.msk [vmem:[%s300_s28] sm:$0xff] %vm334_vm0, %v706_v35 }
 0x475   : > { %1059 = shalt.err (!%p1056_p0)
}
 0x476   : > { %918 = dma.vmem_to_hbm [thread:$0]  (%p1209_p9), %s725_s8, 128, %s727_s14, %s711_s24  }
 0x479   : > { %v707_v36 = vpop.f32.mrf.mxu1 }
 0x47a PF: > { %s738_s30 = sand.u32 1, %s1094_s21   ;;  %p925_p1 = pnand %p822_p12, %p1216_p11 }
 0x47b   : > { %s739_s20 = scalar_lea.sflag [#allocation6], %s738_s30 }
 0x47c   : > { %p926_p2 = pneg %p925_p1 }
 0x47e   : > { %1089 = dma.done.wait (%p926_p2), %s739_s20, 128  }
 0x47f   : > { %1091 = vsyncadd (%p926_p2), %s739_s20, 4294967168  ;;  %s22_s26 = sadd.s32 1, %s1114_s26   ;;  %s1356_s21 = smov %s1098_s22 }
 0x480   : > { %p19_p3 = scmp.ge.s32.totalorder %s22_s26, 4   ;;  %s1357_s22 = smov %s1102_s23 }
 0x481   : > { %s1358_s23 = smov %s1214_s11  ;;  %s1359_s24 = smov %s1110_s25 }
 0x482   : > { %s1360_s25 = smov %s1362_s29  ;;  %21 = sbr.rel (!%p19_p3) target bundleno = 6 (0x6), region = 96 }
 0x487   :  { %745 = vsyncpa [#allocation5], 1 }
 0x488   :  { %747 = vsyncpa [#allocation5 + $0x1], 1 }
 0x489   :  { %748 = vsyncpa [#allocation6], 1 }
 0x48a   :  { %750 = vsyncpa [#allocation6 + $0x1], 1 }

</bundles_post_ra>
